<compile_context>
chip_gen: v7x
topology: tpu7x:2x2x1
jax: 0.10.0
libtpu: 0.0.40
codegen_flags: <defaults>
</compile_context>

<pallas_src>
import functools

import jax
import jax.numpy as jnp
from jax.experimental import pallas as pl
from jax.experimental.pallas import tpu as pltpu


def _round_up(x, m):
    return ((x + m - 1) // m) * m


def _pad_to(x, shape):
    pads = [(0, t - s) for s, t in zip(x.shape, shape)]
    return jnp.pad(x, pads)


def _gcn_kernel(x_ref, a_ref, wg1_ref, wg2_ref, l3w_ref, b_ref, o_ref,
                *, fin_p, h_p, c2_p, f50_p, out_p):
    """One grid step processes all graphs of this split, stacked along rows.

    x_ref  : [1, M, fin_p]        bf16   (M = graphs_per_split * N node rows)
    a_ref  : [1, M, M]            bf16   block-diagonal adjacency
    wg1_ref: [h_p, c2_p + f50_p]  bf16   = [ w2 | l2w ]
    wg2_ref: [fin_p + c2_p, h_p]  bf16   = [ w1 ; l1w ]
    l3w_ref: [f50_p, out_p]       bf16
    b_ref  : [1, 2*h_p + c2_p + f50_p + out_p] f32  = [b1|b2|l1b|l2b|l3b]
    o_ref  : [1, M, out_p]        f32
    """
    bf16 = jnp.bfloat16
    f32 = jnp.float32

    x = x_ref[0]          # [M, fin_p] bf16
    a = a_ref[0]          # [M, M]     bf16 (block-diag over graphs)

    # Static, lane/sublane-aligned slices into the packed operands.
    w1 = wg2_ref[0:fin_p, :]                       # [fin_p, h_p]
    l1w = wg2_ref[fin_p:fin_p + c2_p, :]           # [c2_p, h_p]
    w2 = wg1_ref[:, 0:c2_p]                        # [h_p, c2_p]
    l2w = wg1_ref[:, c2_p:c2_p + f50_p]            # [h_p, f50_p]

    o1 = h_p
    o2 = o1 + c2_p
    o3 = o2 + h_p
    o4 = o3 + f50_p
    b1 = b_ref[:, 0:o1]
    b2 = b_ref[:, o1:o2]
    l1b = b_ref[:, o2:o3]
    l2b = b_ref[:, o3:o4]
    l3b = b_ref[:, o4:]

    # conv1: relu(A @ (x @ W1) + b1)   -- one block-diag A matmul for all graphs
    xw = jnp.dot(x, w1, preferred_element_type=f32)
    h = jnp.dot(a, xw.astype(bf16), preferred_element_type=f32) + b1
    h = jnp.maximum(h, 0.0)

    # conv2: relu(A @ (h @ W2) + b2)
    hw = jnp.dot(h.astype(bf16), w2, preferred_element_type=f32)
    h = jnp.dot(a, hw.astype(bf16), preferred_element_type=f32) + b2
    h = jnp.maximum(h, 0.0)

    # linear1 + relu
    h = jnp.dot(h.astype(bf16), l1w, preferred_element_type=f32)
    h = jnp.maximum(h + l1b, 0.0)

    # linear2 + relu
    h = jnp.dot(h.astype(bf16), l2w, preferred_element_type=f32)
    h = jnp.maximum(h + l2b, 0.0)

    # linear3 (no activation), lane-dense padded store
    out = jnp.dot(h.astype(bf16), l3w_ref[...], preferred_element_type=f32)
    o_ref[0] = out + l3b


@functools.partial(jax.jit, static_argnames=("out_size", "num_splits"))
def gcn_forward(x, A, params, *, out_size, num_splits=1):
    """x: [G, N, Fin] f32, A: [G, N, N] f32, params: dict of f32 weights/biases.

    num_splits: number of grid steps (1 for v5e/v6e; 2 on v7x so megacore
    sharding via the "parallel" axis puts half the graphs on each TensorCore).
    Returns [G, N, out_size] f32.
    """
    G, N, Fin = x.shape
    hidden = params["w1"].shape[1]
    assert G % num_splits == 0, "num_splits must divide the number of graphs"
    GS = G // num_splits          # graphs per grid step
    M = GS * N                    # stacked node rows per grid step

    # Lane-dense padded dims (multiples of 128; review: do NOT pad beyond 128).
    fin_p = _round_up(Fin, 128)
    h_p = _round_up(hidden, 128)
    c2_p = _round_up(300, 128)        # 384
    f50_p = _round_up(50, 128)        # 128
    out_p = _round_up(out_size, 128)

    bf16 = jnp.bfloat16

    # ---- Pack activations: stack graphs of each split along the row axis ----
    x_p = _pad_to(x, (G, N, fin_p)).astype(bf16).reshape(num_splits, M, fin_p)

    # Block-diagonal adjacency per split: A_bd[s] = diag(A[s*GS], ..., A[s*GS+GS-1])
    A_r = A.reshape(num_splits, GS, N, N)
    eye_g = jnp.eye(GS, dtype=A.dtype)
    A_bd = jnp.einsum("gh,sgij->sgihj", eye_g, A_r)      # [S, GS, N, GS, N]
    A_bd = A_bd.reshape(num_splits, M, M).astype(bf16)

    # ---- Pack weights/biases: 12 operands -> 4 (plus x, A) ----
    w1 = _pad_to(params["w1"], (fin_p, h_p)).astype(bf16)
    w2 = _pad_to(params["w2"], (h_p, c2_p)).astype(bf16)
    l1w = _pad_to(params["l1w"], (c2_p, h_p)).astype(bf16)
    l2w = _pad_to(params["l2w"], (h_p, f50_p)).astype(bf16)
    l3w = _pad_to(params["l3w"], (f50_p, out_p)).astype(bf16)

    wg1 = jnp.concatenate([w2, l2w], axis=1)             # [h_p, c2_p + f50_p]
    wg2 = jnp.concatenate([w1, l1w], axis=0)             # [fin_p + c2_p, h_p]

    bcat = jnp.concatenate([
        _pad_to(params["b1"], (1, h_p)),
        _pad_to(params["b2"], (1, c2_p)),
        _pad_to(params["l1b"], (1, h_p)),
        _pad_to(params["l2b"], (1, f50_p)),
        _pad_to(params["l3b"], (1, out_p)),
    ], axis=1)                                           # [1, 2*h_p+c2_p+f50_p+out_p] f32

    weights = (wg1, wg2, l3w, bcat)

    # ---- Specs: per-split blocks for x/A/out; weights resident (const index) ----
    x_spec = pl.BlockSpec((1, M, fin_p), lambda s: (s, 0, 0))
    a_spec = pl.BlockSpec((1, M, M), lambda s: (s, 0, 0))
    w_specs = [pl.BlockSpec(w.shape, lambda s: (0, 0)) for w in weights]
    out_spec = pl.BlockSpec((1, M, out_p), lambda s: (s, 0, 0))

    # ---- VMEM limit from the actual buffer footprint (not a flat 32 MiB) ----
    def _nbytes(a):
        return int(a.size) * a.dtype.itemsize

    per_step_io = (M * fin_p * 2) + (M * M * 2) + (M * out_p * 4)   # x + A + out blocks
    resident = sum(_nbytes(w) for w in weights)
    # double-buffered I/O + (conservatively) double-buffered weights + headroom
    vmem_limit = int(2 * (per_step_io + resident) + (8 << 20))

    # ---- Cost hint ----
    flops_per_split = 2 * M * (
        fin_p * h_p + M * h_p            # conv1 (xW, block-diag A mix)
        + h_p * c2_p + M * c2_p          # conv2
        + c2_p * h_p                     # linear1
        + h_p * f50_p                    # linear2
        + f50_p * out_p                  # linear3
    )
    bytes_accessed = (_nbytes(x_p) + _nbytes(A_bd) + resident
                      + num_splits * M * out_p * 4)
    cost = pl.CostEstimate(flops=num_splits * flops_per_split,
                           transcendentals=0,
                           bytes_accessed=int(bytes_accessed))

    kernel = functools.partial(_gcn_kernel, fin_p=fin_p, h_p=h_p, c2_p=c2_p,
                               f50_p=f50_p, out_p=out_p)

    out_padded = pl.pallas_call(
        kernel,
        out_shape=jax.ShapeDtypeStruct((num_splits, M, out_p), jnp.float32),
        grid=(num_splits,),
        in_specs=[x_spec, a_spec] + w_specs,
        out_specs=out_spec,
        compiler_params=pltpu.CompilerParams(
            dimension_semantics=("parallel",),
            vmem_limit_bytes=vmem_limit,
        ),
        cost_estimate=cost,
    )(x_p, A_bd, *weights)

    return out_padded.reshape(G, N, out_p)[:, :, :out_size]


def init_params(key, input_size, hidden_size, output_size):
    """Deterministic synthetic parameters (shapes match the PyTorch module)."""
    ks = jax.random.split(key, 10)
    scale = 0.1

    def w(k, shape):
        return (scale * jax.random.normal(k, shape)).astype(jnp.float32)

    return {
        # GraphConvolutionLayer weights are [in_features, out_features]
        "w1": w(ks[0], (input_size, hidden_size)),
        "b1": w(ks[1], (1, hidden_size)),
        "w2": w(ks[2], (hidden_size, 300)),
        "b2": w(ks[3], (1, 300)),
        # nn.Linear weights are [out, in] in PyTorch; stored pre-transposed [in, out]
        "l1w": w(ks[4], (300, hidden_size)),
        "l1b": w(ks[5], (1, hidden_size)),
        "l2w": w(ks[6], (hidden_size, 50)),
        "l2b": w(ks[7], (1, 50)),
        "l3w": w(ks[8], (50, output_size)),
        "l3b": w(ks[9], (1, output_size)),
    }


def reference_forward(x, A, p):
    """Plain-JAX reference mirroring the kernel's bf16-operand / f32-accumulate math.

    NOTE: intermediates are cast to bf16 before each MXU matmul (as in the
    kernel); vs. a pure-f32 PyTorch forward the A-aggregation accumulates bf16
    rounding error that grows with N -- at these sizes it is well within the
    1e-2 tolerance used below.
    """
    bf16, f32 = jnp.bfloat16, jnp.float32

    def dot(a, b):
        return jnp.dot(a.astype(bf16), b.astype(bf16), preferred_element_type=f32)

    h = jnp.maximum(dot(A, dot(x, p["w1"])) + p["b1"], 0.0)
    h = jnp.maximum(dot(A, dot(h, p["w2"])) + p["b2"], 0.0)
    h = jnp.maximum(dot(h, p["l1w"]) + p["l1b"], 0.0)
    h = jnp.maximum(dot(h, p["l2w"]) + p["l2b"], 0.0)
    return dot(h, p["l3w"]) + p["l3b"]


if __name__ == "__main__":
    input_size, hidden_size, output_size = 16, 32, 10
    G = 4   # graphs
    N = 8   # nodes per graph

    key = jax.random.PRNGKey(0)
    kx, ka, kp = jax.random.split(key, 3)

    x = jax.random.normal(kx, (G, N, input_size), dtype=jnp.float32)
    # Symmetric, row-normalized-ish adjacency with self-loops (per graph).
    A_raw = jax.random.uniform(ka, (G, N, N), dtype=jnp.float32)
    A_raw = (A_raw + jnp.swapaxes(A_raw, -1, -2)) * 0.5 + jnp.eye(N, dtype=jnp.float32)
    A = A_raw / jnp.sum(A_raw, axis=-1, keepdims=True)

    params = init_params(kp, input_size, hidden_size, output_size)

    ref = jax.vmap(lambda xg, ag: reference_forward(xg, ag, params))(x, A)

    # Single grid step: all graphs fused (best on v5e/v6e, 1 TensorCore).
    out1 = gcn_forward(x, A, params, out_size=output_size, num_splits=1)
    out1 = jax.block_until_ready(out1)
    assert out1.shape == (G, N, output_size)
    assert jnp.allclose(out1, ref, atol=1e-2, rtol=1e-2), "mismatch (num_splits=1)"

    # Two parallel grid steps: megacore sharding on v7x (harmless elsewhere).
    out2 = gcn_forward(x, A, params, out_size=output_size, num_splits=2)
    out2 = jax.block_until_ready(out2)
    assert jnp.allclose(out2, ref, atol=1e-2, rtol=1e-2), "mismatch (num_splits=2)"

    print("KERNEL_OK")
</pallas_src>

<mosaic_0001>
module attributes {stable_mosaic.version = 11 : i64} {
  func.func @_gcn_kernel(%arg0: i32, %arg1: memref<1x32x128xbf16, #tpu.memory_space<vmem>>, %arg2: memref<1x32x32xbf16, #tpu.memory_space<vmem>>, %arg3: memref<128x512xbf16, #tpu.memory_space<vmem>>, %arg4: memref<512x128xbf16, #tpu.memory_space<vmem>>, %arg5: memref<128x128xbf16, #tpu.memory_space<vmem>>, %arg6: memref<1x896xf32, #tpu.memory_space<vmem>>, %arg7: memref<1x32x128xf32, #tpu.memory_space<vmem>>) attributes {dimension_semantics = [#tpu.dimension_semantics<parallel>], iteration_bounds = array<i64: 1>, scalar_prefetch = 0 : i64, scratch_operands = 0 : i64, tpu.core_type = #tpu.core_type<tc>, window_params = [{transform_indices = @transform_0, window_bounds = array<i64: 1, 32, 128>}, {transform_indices = @transform_1, window_bounds = array<i64: 1, 32, 32>}, {pipeline_mode = #tpu.pipeline_mode<synchronous>, transform_indices = @transform_2, window_bounds = array<i64: 128, 512>}, {pipeline_mode = #tpu.pipeline_mode<synchronous>, transform_indices = @transform_3, window_bounds = array<i64: 512, 128>}, {pipeline_mode = #tpu.pipeline_mode<synchronous>, transform_indices = @transform_4, window_bounds = array<i64: 128, 128>}, {pipeline_mode = #tpu.pipeline_mode<synchronous>, transform_indices = @transform_5, window_bounds = array<i64: 1, 896>}, {transform_indices = @transform_6, window_bounds = array<i64: 1, 32, 128>}]} {
    %c0 = arith.constant 0 : index
    %c0_0 = arith.constant 0 : index
    %c0_1 = arith.constant 0 : index
    %0 = vector.load %arg1[%c0, %c0_0, %c0_1] : memref<1x32x128xbf16, #tpu.memory_space<vmem>>, vector<1x32x128xbf16>
    %1 = vector.shape_cast %0 : vector<1x32x128xbf16> to vector<32x128xbf16>
    %c0_2 = arith.constant 0 : index
    %c0_3 = arith.constant 0 : index
    %c0_4 = arith.constant 0 : index
    %2 = vector.load %arg2[%c0_2, %c0_3, %c0_4] : memref<1x32x32xbf16, #tpu.memory_space<vmem>>, vector<1x32x32xbf16>
    %3 = vector.shape_cast %2 : vector<1x32x32xbf16> to vector<32x32xbf16>
    %c0_5 = arith.constant 0 : index
    %c0_6 = arith.constant 0 : index
    %4 = vector.load %arg4[%c0_5, %c0_6] : memref<512x128xbf16, #tpu.memory_space<vmem>>, vector<128x128xbf16>
    %c128 = arith.constant 128 : index
    %c0_7 = arith.constant 0 : index
    %5 = vector.load %arg4[%c128, %c0_7] : memref<512x128xbf16, #tpu.memory_space<vmem>>, vector<384x128xbf16>
    %c0_8 = arith.constant 0 : index
    %c0_9 = arith.constant 0 : index
    %6 = vector.load %arg3[%c0_8, %c0_9] : memref<128x512xbf16, #tpu.memory_space<vmem>>, vector<128x384xbf16>
    %c0_10 = arith.constant 0 : index
    %c384 = arith.constant 384 : index
    %7 = vector.load %arg3[%c0_10, %c384] : memref<128x512xbf16, #tpu.memory_space<vmem>>, vector<128x128xbf16>
    %c0_11 = arith.constant 0 : index
    %c0_12 = arith.constant 0 : index
    %8 = vector.load %arg6[%c0_11, %c0_12] : memref<1x896xf32, #tpu.memory_space<vmem>>, vector<1x128xf32>
    %c0_13 = arith.constant 0 : index
    %c128_14 = arith.constant 128 : index
    %9 = vector.load %arg6[%c0_13, %c128_14] : memref<1x896xf32, #tpu.memory_space<vmem>>, vector<1x384xf32>
    %c0_15 = arith.constant 0 : index
    %c512 = arith.constant 512 : index
    %10 = vector.load %arg6[%c0_15, %c512] : memref<1x896xf32, #tpu.memory_space<vmem>>, vector<1x128xf32>
    %c0_16 = arith.constant 0 : index
    %c640 = arith.constant 640 : index
    %11 = vector.load %arg6[%c0_16, %c640] : memref<1x896xf32, #tpu.memory_space<vmem>>, vector<1x128xf32>
    %c0_17 = arith.constant 0 : index
    %c768 = arith.constant 768 : index
    %12 = vector.load %arg6[%c0_17, %c768] : memref<1x896xf32, #tpu.memory_space<vmem>>, vector<1x128xf32>
    %cst = arith.constant dense<0.000000e+00> : vector<32x128xf32>
    %13 = tpu.matmul %1, %4, %cst {dimension_numbers = #tpu.dot_dimension_numbers<[1], [0], [0], [1], [0, 0, 1, 1], [], []>} : vector<32x128xbf16>, vector<128x128xbf16>, vector<32x128xf32> -> vector<32x128xf32>
    %14 = arith.truncf %13 : vector<32x128xf32> to vector<32x128xbf16>
    %cst_18 = arith.constant dense<0.000000e+00> : vector<32x128xf32>
    %15 = tpu.matmul %3, %14, %cst_18 {dimension_numbers = #tpu.dot_dimension_numbers<[1], [0], [0], [1], [0, 0, 1, 1], [], []>} : vector<32x32xbf16>, vector<32x128xbf16>, vector<32x128xf32> -> vector<32x128xf32>
    %16 = vector.broadcast %8 : vector<1x128xf32> to vector<32x128xf32>
    %17 = arith.addf %15, %16 : vector<32x128xf32>
    %cst_19 = arith.constant 0.000000e+00 : f32
    %18 = vector.broadcast %cst_19 : f32 to vector<32x128xf32>
    %19 = arith.maximumf %17, %18 : vector<32x128xf32>
    %20 = arith.truncf %19 : vector<32x128xf32> to vector<32x128xbf16>
    %cst_20 = arith.constant dense<0.000000e+00> : vector<32x384xf32>
    %21 = tpu.matmul %20, %6, %cst_20 {dimension_numbers = #tpu.dot_dimension_numbers<[1], [0], [0], [1], [0, 0, 1, 1], [], []>} : vector<32x128xbf16>, vector<128x384xbf16>, vector<32x384xf32> -> vector<32x384xf32>
    %22 = arith.truncf %21 : vector<32x384xf32> to vector<32x384xbf16>
    %cst_21 = arith.constant dense<0.000000e+00> : vector<32x384xf32>
    %23 = tpu.matmul %3, %22, %cst_21 {dimension_numbers = #tpu.dot_dimension_numbers<[1], [0], [0], [1], [0, 0, 1, 1], [], []>} : vector<32x32xbf16>, vector<32x384xbf16>, vector<32x384xf32> -> vector<32x384xf32>
    %24 = vector.broadcast %9 : vector<1x384xf32> to vector<32x384xf32>
    %25 = arith.addf %23, %24 : vector<32x384xf32>
    %cst_22 = arith.constant 0.000000e+00 : f32
    %26 = vector.broadcast %cst_22 : f32 to vector<32x384xf32>
    %27 = arith.maximumf %25, %26 : vector<32x384xf32>
    %28 = arith.truncf %27 : vector<32x384xf32> to vector<32x384xbf16>
    %cst_23 = arith.constant dense<0.000000e+00> : vector<32x128xf32>
    %29 = tpu.matmul %28, %5, %cst_23 {dimension_numbers = #tpu.dot_dimension_numbers<[1], [0], [0], [1], [0, 0, 1, 1], [], []>} : vector<32x384xbf16>, vector<384x128xbf16>, vector<32x128xf32> -> vector<32x128xf32>
    %30 = vector.broadcast %10 : vector<1x128xf32> to vector<32x128xf32>
    %31 = arith.addf %29, %30 : vector<32x128xf32>
    %cst_24 = arith.constant 0.000000e+00 : f32
    %32 = vector.broadcast %cst_24 : f32 to vector<32x128xf32>
    %33 = arith.maximumf %31, %32 : vector<32x128xf32>
    %34 = arith.truncf %33 : vector<32x128xf32> to vector<32x128xbf16>
    %cst_25 = arith.constant dense<0.000000e+00> : vector<32x128xf32>
    %35 = tpu.matmul %34, %7, %cst_25 {dimension_numbers = #tpu.dot_dimension_numbers<[1], [0], [0], [1], [0, 0, 1, 1], [], []>} : vector<32x128xbf16>, vector<128x128xbf16>, vector<32x128xf32> -> vector<32x128xf32>
    %36 = vector.broadcast %11 : vector<1x128xf32> to vector<32x128xf32>
    %37 = arith.addf %35, %36 : vector<32x128xf32>
    %cst_26 = arith.constant 0.000000e+00 : f32
    %38 = vector.broadcast %cst_26 : f32 to vector<32x128xf32>
    %39 = arith.maximumf %37, %38 : vector<32x128xf32>
    %40 = arith.truncf %39 : vector<32x128xf32> to vector<32x128xbf16>
    %c0_27 = arith.constant 0 : index
    %c0_28 = arith.constant 0 : index
    %41 = vector.load %arg5[%c0_27, %c0_28] : memref<128x128xbf16, #tpu.memory_space<vmem>>, vector<128x128xbf16>
    %cst_29 = arith.constant dense<0.000000e+00> : vector<32x128xf32>
    %42 = tpu.matmul %40, %41, %cst_29 {dimension_numbers = #tpu.dot_dimension_numbers<[1], [0], [0], [1], [0, 0, 1, 1], [], []>} : vector<32x128xbf16>, vector<128x128xbf16>, vector<32x128xf32> -> vector<32x128xf32>
    %43 = vector.broadcast %12 : vector<1x128xf32> to vector<32x128xf32>
    %44 = arith.addf %42, %43 : vector<32x128xf32>
    %c0_30 = arith.constant 0 : index
    %c0_31 = arith.constant 0 : index
    %c0_32 = arith.constant 0 : index
    %45 = vector.load %arg7[%c0_30, %c0_31, %c0_32] : memref<1x32x128xf32, #tpu.memory_space<vmem>>, vector<1x32x128xf32>
    %46 = vector.shape_cast %45 : vector<1x32x128xf32> to vector<32x128xf32>
    %47 = vector.shape_cast %44 : vector<32x128xf32> to vector<1x32x128xf32>
    tpu.vector_store %arg7[%c0_30, %c0_31, %c0_32], %47 {strides = array<i32>} : memref<1x32x128xf32, #tpu.memory_space<vmem>>, vector<1x32x128xf32>,
    return
  }
  func.func @transform_0(%arg0: i32) -> (i32, i32, i32) {
    %c0_i32 = arith.constant 0 : i32
    %c0_i32_0 = arith.constant 0 : i32
    %c0_i32_1 = arith.constant 0 : i32
    return %arg0, %c0_i32, %c0_i32_0 : i32, i32, i32
  }
  func.func @transform_1(%arg0: i32) -> (i32, i32, i32) {
    %c0_i32 = arith.constant 0 : i32
    %c0_i32_0 = arith.constant 0 : i32
    %c0_i32_1 = arith.constant 0 : i32
    return %arg0, %c0_i32, %c0_i32_0 : i32, i32, i32
  }
  func.func @transform_2(%arg0: i32) -> (i32, i32) {
    %c0_i32 = arith.constant 0 : i32
    %c0_i32_0 = arith.constant 0 : i32
    %c0_i32_1 = arith.constant 0 : i32
    return %c0_i32, %c0_i32_0 : i32, i32
  }
  func.func @transform_3(%arg0: i32) -> (i32, i32) {
    %c0_i32 = arith.constant 0 : i32
    %c0_i32_0 = arith.constant 0 : i32
    %c0_i32_1 = arith.constant 0 : i32
    return %c0_i32, %c0_i32_0 : i32, i32
  }
  func.func @transform_4(%arg0: i32) -> (i32, i32) {
    %c0_i32 = arith.constant 0 : i32
    %c0_i32_0 = arith.constant 0 : i32
    %c0_i32_1 = arith.constant 0 : i32
    return %c0_i32, %c0_i32_0 : i32, i32
  }
  func.func @transform_5(%arg0: i32) -> (i32, i32) {
    %c0_i32 = arith.constant 0 : i32
    %c0_i32_0 = arith.constant 0 : i32
    %c0_i32_1 = arith.constant 0 : i32
    return %c0_i32, %c0_i32_0 : i32, i32
  }
  func.func @transform_6(%arg0: i32) -> (i32, i32, i32) {
    %c0_i32 = arith.constant 0 : i32
    %c0_i32_0 = arith.constant 0 : i32
    %c0_i32_1 = arith.constant 0 : i32
    return %arg0, %c0_i32, %c0_i32_0 : i32, i32, i32
  }
}

</mosaic_0001>

<bundles_post_ra>
// kernel: gcn_forward.1
= control target key start
LH: loop header
LB: loop body
LE: loop exit
PB: predicated region body
PF: predicated region fallthrough
CT: control target
= control target key end

     0   :  { %s1923_s0 = inlined_call_operand.vmem [shape: bf16[1,32,128], index: 0, kind: input, shape index: {}]   ;;  %s1924_s1 = inlined_call_operand.vmem [shape: bf16[1,32,32], index: 1, kind: input, shape index: {}]   ;;  %s1925_s2 = inlined_call_operand.vmem [shape: bf16[128,512], index: 2, kind: input, shape index: {}]   ;;  %s1926_s3 = inlined_call_operand.vmem [shape: bf16[512,128], index: 3, kind: input, shape index: {}]   ;;  %s1927_s4 = inlined_call_operand.vmem [shape: bf16[128,128], index: 4, kind: input, shape index: {}]   ;;  %s1928_s5 = inlined_call_operand.vmem [shape: f32[1,896], index: 5, kind: input, shape index: {}]   ;;  %s1929_s6 = inlined_call_operand.hbm [shape: f32[1,32,128], index: 6, kind: output, shape index: {}]  }
   0x1   :  { %v1505_v0 = vld [vmem:[%s1926_s3] sm:$0xff]   ;;  %v1506_v1 = vld [vmem:[%s1926_s3 + $0x8] sm:$0xff]   ;;  %v1507_v2 = vld [vmem:[%s1926_s3 + $0x10] sm:$0xff]  }
   0x2   :  { %1385 = vmatprep.subr.bf16.mxu0 %v1505_v0  ;;  %v1508_v3 = vld [vmem:[%s1926_s3 + $0x18] sm:$0xff]   ;;  %v1513_v4 = vld [vmem:[%s1923_s0] sm:$0xff]   ;;  %v1510_v6 = vld [vmem:[%s1926_s3 + $0x28] sm:$0xff]  }
   0x3   :  { %1386 = vmatpush3.bf16.msra.mxu0 %v1505_v0  ;;  %v1509_v5 = vld [vmem:[%s1926_s3 + $0x20] sm:$0xff]   ;;  %1401 = vmatprep.mubr.bf16.mxu0 %v1513_v4  ;;  %v1511_v7 = vld [vmem:[%s1926_s3 + $0x30] sm:$0xff]   ;;  %v1512_v8 = vld [vmem:[%s1926_s3 + $0x38] sm:$0xff]  }
   0x4   :  { %1387 = vmatprep.subr.bf16.mxu0 %v1506_v1  ;;  %v1514_v9 = vld [vmem:[%s1923_s0 + $0x8] sm:$0xff]  }
   0x7   :  { %1388 = vmatpush3.bf16.msra.mxu0 %v1506_v1 }
   0x8   :  { %1389 = vmatprep.subr.bf16.mxu0 %v1507_v2 }
   0xb   :  { %1390 = vmatpush3.bf16.msra.mxu0 %v1507_v2 }
   0xc   :  { %1391 = vmatprep.subr.bf16.mxu0 %v1508_v3 }
   0xf   :  { %1392 = vmatpush3.bf16.msra.mxu0 %v1508_v3 }
  0x10   :  { %1393 = vmatprep.subr.bf16.mxu0 %v1509_v5 }
  0x13   :  { %1394 = vmatpush3.bf16.msra.mxu0 %v1509_v5 }
  0x14   :  { %1395 = vmatprep.subr.bf16.mxu0 %v1510_v6 }
  0x17   :  { %1396 = vmatpush3.bf16.msra.mxu0 %v1510_v6 }
  0x18   :  { %1397 = vmatprep.subr.bf16.mxu0 %v1511_v7 }
  0x1b   :  { %1398 = vmatpush3.bf16.msra.mxu0 %v1511_v7 }
  0x1c   :  { %1399 = vmatprep.subr.bf16.mxu0 %v1512_v8 }
  0x1f   :  { %1400 = vmatpush3.bf16.msra.mxu0 %v1512_v8 }
  0x22   :  { %1402 = vmatmul.mubr.bf16.vlgmr.msra.gmra.mrb[0].mxu0 %v1514_v9 }
  0x23   :  { %11 = vsyncpa [#allocation3], 0  ;;  %v1685_v10 = vld [vmem:[%s1924_s1] sm:$0xff]   ;;  %vm277_vm0 = vcmask 261120   ;;  %v1520_v11 = vld [vmem:[%s1925_s2 + $0x8] ss:$16 sps:$4 sm:$0xff]  }
  0x24   :  { %1409 = vmatprep.mubr.msk.bf16.mxu1 %vm277_vm0, %v1685_v10  ;;  %1413 = vmatprep.subr.bf16.mxu0 %v1520_v11  ;;  %v1524_v12 = vld [vmem:[%s1925_s2 + $0x28] ss:$16 sps:$4 sm:$0xff]   ;;  %v1519_v23 = vld [vmem:[%s1925_s2 + $0x4] ss:$16 sps:$4 sm:$0xff]   ;;  %v1517_v25 = vld [vmem:[%s1925_s2] ss:$16 sps:$4 sm:$0xff]  }
  0x25   :  { %1414 = vmatpush3.bf16.msra.mxu0 %v1520_v11  ;;  %v1528_v13 = vld [vmem:[%s1925_s2 + $0x48] ss:$16 sps:$4 sm:$0xff]   ;;  %v1523_v26 = vld [vmem:[%s1925_s2 + $0x24] ss:$16 sps:$4 sm:$0xff]   ;;  %v1521_v27 = vld [vmem:[%s1925_s2 + $0x20] ss:$16 sps:$4 sm:$0xff]  }
  0x26   :  { %1415 = vmatprep.subr.bf16.mxu0 %v1524_v12  ;;  %v1532_v14 = vld [vmem:[%s1925_s2 + $0x68] ss:$16 sps:$4 sm:$0xff]   ;;  %v1527_v28 = vld [vmem:[%s1925_s2 + $0x44] ss:$16 sps:$4 sm:$0xff]   ;;  %v1525_v29 = vld [vmem:[%s1925_s2 + $0x40] ss:$16 sps:$4 sm:$0xff]  }
  0x27   :  { %v1536_v15 = vld [vmem:[%s1925_s2 + $0x88] ss:$16 sps:$4 sm:$0xff]   ;;  %v1531_v30 = vld [vmem:[%s1925_s2 + $0x64] ss:$16 sps:$4 sm:$0xff]   ;;  %v1529_v31 = vld [vmem:[%s1925_s2 + $0x60] ss:$16 sps:$4 sm:$0xff]  }
  0x28   :  { %v1540_v16 = vld [vmem:[%s1925_s2 + $0xa8] ss:$16 sps:$4 sm:$0xff]   ;;  %v1535_v32 = vld [vmem:[%s1925_s2 + $0x84] ss:$16 sps:$4 sm:$0xff]   ;;  %v1533_v33 = vld [vmem:[%s1925_s2 + $0x80] ss:$16 sps:$4 sm:$0xff]  }
  0x29   :  { %1416 = vmatpush3.bf16.msra.mxu0 %v1524_v12  ;;  %v1713_v24 = vld [vmem:[%s1924_s1 + $0x8] sm:$0xff]   ;;  %v1539_v34 = vld [vmem:[%s1925_s2 + $0xa4] ss:$16 sps:$4 sm:$0xff]   ;;  %v1537_v35 = vld [vmem:[%s1925_s2 + $0xa0] ss:$16 sps:$4 sm:$0xff]   ;;  %v1613_v42 = vmov 0  }
  0x2a   :  { %1417 = vmatprep.subr.bf16.mxu0 %v1528_v13  ;;  %v1543_v36 = vld [vmem:[%s1925_s2 + $0xc4] ss:$16 sps:$4 sm:$0xff]   ;;  %v1541_v37 = vld [vmem:[%s1925_s2 + $0xc0] ss:$16 sps:$4 sm:$0xff]   ;;  %v1544_v38 = vld [vmem:[%s1925_s2 + $0xc8] ss:$16 sps:$4 sm:$0xff]  }
  0x2b   :  { %v1547_v39 = vld [vmem:[%s1925_s2 + $0xe4] ss:$16 sps:$4 sm:$0xff]   ;;  %v1545_v40 = vld [vmem:[%s1925_s2 + $0xe0] ss:$16 sps:$4 sm:$0xff]   ;;  %v1548_v41 = vld [vmem:[%s1925_s2 + $0xe8] ss:$16 sps:$4 sm:$0xff]  }
  0x2c   :  { %v1223_v43 = vld [vmem:[%s1928_s5] ss:$0 sm:$0xff]  ;;  %s1614_s24 = smov [#allocation2]  }
  0x2d   :  { %1418 = vmatpush3.bf16.msra.mxu0 %v1528_v13  ;;  %v1552_v8 = vld [vmem:[%s1926_s3 + $0xc0] sm:$0xff]   ;;  %s1202_s25 = sshll.u32 %s1614_s24, 4  ;;  %s1203_s25 = int_to_ptr.vmem [resolvable:$true] %s1202_s25 }
  0x2e   :  { %1419 = vmatprep.subr.bf16.mxu0 %v1532_v14  ;;  %s1589_s26 = scalar_lea.vmem %s1203_s25, 512  ;;  %p1594_p1 = scmp.lt.s32.totalorder %s1203_s25, %s1203_s25 }
  0x2f   :  { %p1590_p0 = scmp.ne.s32.totalorder %s1203_s25, %s1589_s26  ;;  %p1595_p2 = scmp.lt.s32.totalorder %s1589_s26, %s1589_s26 }
  0x31   :  { %1420 = vmatpush3.bf16.msra.mxu0 %v1532_v14  ;;  %v1549_v14 = vld [vmem:[%s1926_s3 + $0x80] sm:$0xff]   ;;  %p1596_p3 = por %p1595_p2, %p1594_p1 }
  0x32   :  { %1421 = vmatprep.subr.bf16.mxu0 %v1536_v15 }
  0x33   :  { %p1597_p4 = pnand %p1596_p3, %p1590_p0 }
  0x35   :  { %1422 = vmatpush3.bf16.msra.mxu0 %v1536_v15  ;;  %v1555_v15 = vld [vmem:[%s1926_s3 + $0xc8] sm:$0xff]  }
  0x36   :  { %1423 = vmatprep.subr.bf16.mxu0 %v1540_v16 }
  0x39   :  { %1424 = vmatpush3.bf16.msra.mxu0 %v1540_v16  ;;  %v1550_v16 = vld [vmem:[%s1926_s3 + $0x40] sm:$0xff]  }
  0x3a   :  { %1425 = vmatprep.subr.bf16.mxu0 %v1544_v38 }
  0x3d   :  { %1426 = vmatpush3.bf16.msra.mxu0 %v1544_v38 }
  0x3e   :  { %1427 = vmatprep.subr.bf16.mxu0 %v1548_v41 }
  0x41   :  { %1428 = vmatpush3.bf16.msra.mxu0 %v1548_v41 }
  0xf5   :  { %v1403_v17 = vpop.f32.mrb[0].mxu0 }
  0xf6   :  { %v244_v18 = vpop.f32.mrb[1].mxu0 }
  0xf7   :  { %v1404_v19 = vpop.f32.mrb[2].mxu0 }
  0xf8   :  { %v260_v20 = vpack.c.bf16 %v1404_v19, %v1403_v17  ;;  %v247_v21 = vpop.f32.mrb[3].mxu0  ;;  %v1551_v17 = vld [vmem:[%s1926_s3 + $0x88] sm:$0xff]  }
  0xf9   :  { %v259_v22 = vpack.c.bf16 %v247_v21, %v244_v18  ;;  %v1558_v18 = vld [vmem:[%s1926_s3 + $0xd0] sm:$0xff]   ;;  %v1553_v19 = vld [vmem:[%s1926_s3 + $0x48] sm:$0xff]   ;;  %v1561_v21 = vld [vmem:[%s1926_s3 + $0xd8] sm:$0xff]  }
  0xfb   :  { %1405 = vmatprep.subr.bf16.mxu1 %v259_v22 }
  0xfc   :  { %1406 = vmatpush3.bf16.msra.mxu1 %v259_v22  ;;  %v1557_v22 = vld [vmem:[%s1926_s3 + $0x98] sm:$0xff]  }
  0xfd   :  { %1407 = vmatprep.subr.bf16.mxu1 %v260_v20 }
 0x100   :  { %1408 = vmatpush3.bf16.msra.mxu1 %v260_v20  ;;  %v1554_v20 = vld [vmem:[%s1926_s3 + $0x90] sm:$0xff]  }
 0x101   :  { %467 = vmatprep.subr.bf16.mxu1 %v1519_v23  ;;  %v1564_v23 = vld [vmem:[%s1926_s3 + $0xe0] sm:$0xff]  }
 0x103   :  { %1410 = vmatmul.mubr.msk.bf16.vlgmr.msra.gmra.mrb[0].mxu1 %vm277_vm0, %v1713_v24 }
 0x104   :  { %468 = vmatpush1.bf16.msra.mxu1 %v1517_v25  ;;  %499 = vmatprep.mubr.bf16.mxu1 %v1613_v42  ;;  %v1559_v25 = vld [vmem:[%s1926_s3 + $0x58] sm:$0xff]  }
 0x105   :  { %469 = vmatprep.subr.bf16.mxu1 %v1523_v26  ;;  %v1560_v26 = vld [vmem:[%s1926_s3 + $0xa0] sm:$0xff]  }
 0x108   :  { %470 = vmatpush1.bf16.msra.mxu1 %v1521_v27  ;;  %v1562_v27 = vld [vmem:[%s1926_s3 + $0x60] sm:$0xff]  }
 0x109   :  { %471 = vmatprep.subr.bf16.mxu1 %v1527_v28  ;;  %v1565_v28 = vld [vmem:[%s1926_s3 + $0x68] sm:$0xff]  }
 0x10c   :  { %472 = vmatpush1.bf16.msra.mxu1 %v1525_v29  ;;  %v1566_v29 = vld [vmem:[%s1926_s3 + $0xb0] sm:$0xff]  }
 0x10d   :  { %473 = vmatprep.subr.bf16.mxu1 %v1531_v30  ;;  %v1567_v30 = vld [vmem:[%s1926_s3 + $0xe8] sm:$0xff]  }
 0x110   :  { %474 = vmatpush1.bf16.msra.mxu1 %v1529_v31  ;;  %v1568_v31 = vld [vmem:[%s1926_s3 + $0x70] sm:$0xff]  }
 0x111   :  { %475 = vmatprep.subr.bf16.mxu1 %v1535_v32  ;;  %v1569_v32 = vld [vmem:[%s1926_s3 + $0xb8] sm:$0xff]  }
 0x114   :  { %476 = vmatpush1.bf16.msra.mxu1 %v1533_v33  ;;  %v1570_v33 = vld [vmem:[%s1926_s3 + $0xf0] sm:$0xff]  }
 0x115   :  { %477 = vmatprep.subr.bf16.mxu1 %v1539_v34  ;;  %v1571_v34 = vld [vmem:[%s1926_s3 + $0x78] sm:$0xff]  }
 0x118   :  { %478 = vmatpush1.bf16.msra.mxu1 %v1537_v35  ;;  %v1572_v35 = vld [vmem:[%s1926_s3 + $0xf8] sm:$0xff]  }
 0x119   :  { %479 = vmatprep.subr.bf16.mxu1 %v1543_v36  ;;  %v1573_v36 = vld [vmem:[%s1925_s2 + $0xc] ss:$16 sps:$4 sm:$0xff]  }
 0x11c   :  { %480 = vmatpush1.bf16.msra.mxu1 %v1541_v37  ;;  %v576_v37 = vlaneseq }
 0x11d   :  { %481 = vmatprep.subr.bf16.mxu1 %v1547_v39 }
 0x11e   :  { %v577_v38 = vshrl.u32 %v576_v37, 7 }
 0x120   :  { %482 = vmatpush1.bf16.msra.mxu1 %v1545_v40  ;;  %v586_v39 = vsub.s32 2, %v577_v38  ;;  %v146_v40 = vld [vmem:[%s1928_s5 + $0x1] sm:$0x7]  ;;  %v578_v41 = vsub.s32 0, %v577_v38 }
 0x1d6   :  { %v1411_v44 = vpop.f32.mrb[0].mxu1 }
 0x1d7   :  { %v327_v45 = vadd.f32 %v1411_v44, %v1223_v43  ;;  %v318_v46 = vpop.f32.mrb[1].mxu1  ;;  %v579_v44 = vrot.slane %v146_v40, %v578_v41 }
 0x1d8   :  { %v319_v47 = vadd.f32 %v1223_v43, %v318_v46  ;;  %v1412_v48 = vpop.f32.mrb[2].mxu1 }
 0x1d9   :  { %v330_v49 = vadd.f32 %v1412_v48, %v1223_v43  ;;  %v321_v50 = vpop.f32.mrb[3].mxu1  ;;  %v335_v52 = vmax.f32 %v327_v45, 0.0 }
 0x1da   :  { %v322_v51 = vadd.f32 %v1223_v43, %v321_v50  ;;  %v333_v54 = vmax.f32 %v319_v47, 0.0  ;;  %v587_v43 = vrot.slane %v146_v40, %v586_v39 }
 0x1db   :  { %v336_v53 = vmax.f32 %v330_v49, 0.0 }
 0x1dc   :  { %v334_v55 = vmax.f32 %v322_v51, 0.0 }
 0x1dd   :  { %v338_v56 = vpack.c.bf16 %v336_v53, %v335_v52 }
 0x1de   :  { %v337_v57 = vpack.c.bf16 %v334_v55, %v333_v54 }
 0x1e0   :  { %500 = vmatmul.mubr.bf16.vlgmr.msra.gmra.mrb[4].mxu1 %v337_v57  ;;  %1429 = vmatprep.mubr.bf16.mxu0 %v337_v57 }
 0x1e1   :  { %1430 = vmatmul.mubr.bf16.vlgmr.msra.gmra.mrb[4].mxu0 %v338_v56  ;;  %509 = vmatprep.mubr.bf16.mxu1 %v1613_v42 }
 0x1e2   :  { %1437 = vmatprep.mubr.msk.bf16.mxu0 %vm277_vm0, %v1685_v10 }
 0x1e8   :  { %510 = vmatmul.mubr.bf16.gmra.mrb[8].mxu1 %v338_v56 }
 0x1e9   :  { %623 = vmatprep.mubr.bf16.mxu1 %v1613_v42 }
 0x2b3   :  { %v501_v58 = vpop.f32.mrb[4].mxu1 }
 0x2b4   :  { %v503_v59 = vpop.f32.mrb[5].mxu1  ;;  %v1431_v60 = vpop.f32.mrb[4].mxu0 }
 0x2b5   :  { %v505_v61 = vpop.f32.mrb[6].mxu1  ;;  %v554_v62 = vpop.f32.mrb[5].mxu0 }
 0x2b6   :  { %v569_v63 = vpack.c.bf16 %v505_v61, %v501_v58  ;;  %v507_v0 = vpop.f32.mrb[7].mxu1  ;;  %v1432_v1 = vpop.f32.mrb[6].mxu0 }
 0x2b7   :  { %v570_v2 = vpack.c.bf16 %v507_v0, %v503_v59  ;;  %v574_v3 = vpack.c.bf16 %v1432_v1, %v1431_v60  ;;  %v557_v4 = vpop.f32.mrb[7].mxu0 }
 0x2b8   :  { %v571_v5 = vpack.c.bf16 %v557_v4, %v554_v62 }
 0x2b9   :  { %591 = vmatprep.subr.bf16.mxu1 %v570_v2 }
 0x2ba   :  { %592 = vmatpush1.bf16.msra.mxu1 %v569_v63  ;;  %1433 = vmatprep.subr.bf16.mxu0 %v571_v5 }
 0x2bb   :  { %v511_v6 = vpop.f32.mrb[8].mxu1  ;;  %1434 = vmatpush3.bf16.msra.mxu0 %v571_v5 }
 0x2bc   :  { %v513_v7 = vpop.f32.mrb[9].mxu1  ;;  %1435 = vmatprep.subr.bf16.mxu0 %v574_v3 }
 0x2bd   :  { %v515_v9 = vpop.f32.mrb[10].mxu1 }
 0x2be   :  { %v572_v11 = vpack.c.bf16 %v515_v9, %v511_v6  ;;  %v517_v12 = vpop.f32.mrb[11].mxu1 }
 0x2bf   :  { %v573_v13 = vpack.c.bf16 %v517_v12, %v513_v7  ;;  %1436 = vmatpush3.bf16.msra.mxu0 %v574_v3 }
 0x2c0   :  { %1441 = vmatprep.subr.bf16.mxu0 %v1552_v8 }
 0x2c1   :  { %593 = vmatprep.subr.bf16.mxu1 %v573_v13 }
 0x2c2   :  { %594 = vmatpush1.bf16.msra.mxu1 %v572_v11  ;;  %1438 = vmatmul.mubr.msk.bf16.vlgmr.msra.gmra.mrb[8].mxu0 %vm277_vm0, %v1713_v24 }
 0x2c3   :  { %1327 = vmatprep.subr.bf16.mxu1 %v1549_v14  ;;  %1442 = vmatpush3.bf16.msra.mxu0 %v1552_v8  ;;  %v1574_v14 = vld [vmem:[%s1925_s2 + $0x2c] ss:$16 sps:$4 sm:$0xff]  }
 0x2c4   :  { %1443 = vmatprep.subr.bf16.mxu0 %v1555_v15 }
 0x2c5   :  { %1252 = vmatmul.mubr.msk.bf16.vlgmr.msra.gmra.mrb[12].mxu1 %vm277_vm0, %v1685_v10  ;;  %v1556_v10 = vld [vmem:[%s1926_s3 + $0x50] sm:$0xff]  }
 0x2c6   :  { %633 = vmatprep.mubr.bf16.mxu1 %v1613_v42  ;;  %1328 = vmatpush3.bf16.msra.mxu1 %v1550_v16  ;;  %v582_v42 = vsub.s32 1, %v577_v38 }
 0x2c7   :  { %1329 = vmatprep.subr.bf16.mxu1 %v1551_v17  ;;  %1444 = vmatpush3.bf16.msra.mxu0 %v1555_v15 }
 0x2c8   :  { %1445 = vmatprep.subr.bf16.mxu0 %v1558_v18  ;;  %v583_v46 = vrot.slane %v146_v40, %v582_v42 }
 0x2ca   :  { %1330 = vmatpush3.bf16.msra.mxu1 %v1553_v19 }
 0x2cb   :  { %1331 = vmatprep.subr.bf16.mxu1 %v1554_v20  ;;  %1446 = vmatpush3.bf16.msra.mxu0 %v1558_v18 }
 0x2cc   :  { %1447 = vmatprep.subr.bf16.mxu0 %v1561_v21 }
 0x2cd   :  { %1253 = vmatmul.mubr.msk.bf16.gmra.mrb[16].mxu1 %vm277_vm0, %v1713_v24  ;;  %v1563_v24 = vld [vmem:[%s1926_s3 + $0xa8] sm:$0xff]  }
 0x2ce   :  { %1332 = vmatpush3.bf16.msra.mxu1 %v1556_v10  ;;  %v1575_v10 = vld [vmem:[%s1925_s2 + $0x4c] ss:$16 sps:$4 sm:$0xff]  }
 0x2cf   :  { %1333 = vmatprep.subr.bf16.mxu1 %v1557_v22  ;;  %1448 = vmatpush3.bf16.msra.mxu0 %v1561_v21 }
 0x2d0   :  { %1449 = vmatprep.subr.bf16.mxu0 %v1564_v23 }
 0x2d2   :  { %1334 = vmatpush3.bf16.msra.mxu1 %v1559_v25 }
 0x2d3   :  { %1335 = vmatprep.subr.bf16.mxu1 %v1560_v26  ;;  %1450 = vmatpush3.bf16.msra.mxu0 %v1564_v23 }
 0x2d4   :  { %1451 = vmatprep.subr.bf16.mxu0 %v1567_v30 }
 0x2d6   :  { %1336 = vmatpush3.bf16.msra.mxu1 %v1562_v27  ;;  %v1576_v27 = vld [vmem:[%s1925_s2 + $0x6c] ss:$16 sps:$4 sm:$0xff]  }
 0x2d7   :  { %1337 = vmatprep.subr.bf16.mxu1 %v1563_v24  ;;  %1452 = vmatpush3.bf16.msra.mxu0 %v1567_v30  ;;  %v1577_v24 = vld [vmem:[%s1925_s2 + $0x8c] ss:$16 sps:$4 sm:$0xff]  }
 0x2d8   :  { %1453 = vmatprep.subr.bf16.mxu0 %v1570_v33  ;;  %v1580_v30 = vld [vmem:[%s1925_s2 + $0xec] ss:$16 sps:$4 sm:$0xff]  }
 0x2da   :  { %1338 = vmatpush3.bf16.msra.mxu1 %v1565_v28  ;;  %v1578_v28 = vld [vmem:[%s1925_s2 + $0xac] ss:$16 sps:$4 sm:$0xff]  }
 0x2db   :  { %1339 = vmatprep.subr.bf16.mxu1 %v1566_v29  ;;  %1454 = vmatpush3.bf16.msra.mxu0 %v1570_v33  ;;  %v1579_v29 = vld [vmem:[%s1925_s2 + $0xcc] ss:$16 sps:$4 sm:$0xff]   ;;  %v1583_v33 = vld [vmem:[%s1927_s4 + $0x10] sm:$0xff]  }
 0x2dc   :  { %1455 = vmatprep.subr.bf16.mxu0 %v1572_v35 }
 0x2de   :  { %1340 = vmatpush3.bf16.msra.mxu1 %v1568_v31  ;;  %v1581_v31 = vld [vmem:[%s1927_s4] sm:$0xff]  }
 0x2df   :  { %1341 = vmatprep.subr.bf16.mxu1 %v1569_v32  ;;  %1456 = vmatpush3.bf16.msra.mxu0 %v1572_v35  ;;  %v1582_v32 = vld [vmem:[%s1927_s4 + $0x8] sm:$0xff]   ;;  %v1585_v35 = vld [vmem:[%s1927_s4 + $0x20] sm:$0xff]  }
 0x2e0   :  { %1481 = vmatprep.subr.bf16.mxu0 %v1581_v31 }
 0x2e2   :  { %1342 = vmatpush3.bf16.msra.mxu1 %v1571_v34  ;;  %v1584_v34 = vld [vmem:[%s1927_s4 + $0x18] sm:$0xff]  }
 0x2e3   :  { %1461 = vmatprep.subr.bf16.mxu1 %v1573_v36 }
 0x395   :  { %v1439_v45 = vpop.f32.mrb[8].mxu0 }
 0x396   :  { %v687_v47 = vadd.f32 %v1439_v45, %v587_v43  ;;  %v678_v48 = vpop.f32.mrb[9].mxu0 }
 0x397   :  { %v679_v49 = vadd.f32 %v678_v48, %v587_v43  ;;  %v1440_v50 = vpop.f32.mrb[10].mxu0 }
 0x398   :  { %v625_v51 = vpop.f32.mrb[12].mxu1  ;;  %v701_v52 = vmax.f32 %v687_v47, 0.0  ;;  %v690_v53 = vadd.f32 %v1440_v50, %v587_v43  ;;  %v681_v54 = vpop.f32.mrb[11].mxu0 }
 0x399   :  { %v626_v55 = vadd.f32 %v625_v51, %v579_v44  ;;  %v627_v56 = vpop.f32.mrb[13].mxu1  ;;  %v695_v57 = vmax.f32 %v679_v49, 0.0  ;;  %v682_v58 = vadd.f32 %v681_v54, %v587_v43  ;;  %v1256_v43 = vld [vmem:[%s1928_s5 + $0x4] ss:$0 sm:$0xff] }
 0x39a   :  { %v628_v59 = vadd.f32 %v627_v56, %v583_v46  ;;  %v629_v60 = vpop.f32.mrb[14].mxu1  ;;  %v704_v61 = vmax.f32 %v690_v53, 0.0 }
 0x39b   :  { %v630_v62 = vadd.f32 %v629_v60, %v579_v44  ;;  %v631_v63 = vpop.f32.mrb[15].mxu1  ;;  %v698_v0 = vmax.f32 %v682_v58, 0.0  ;;  %v693_v3 = vmax.f32 %v626_v55, 0.0 }
 0x39c   :  { %v632_v1 = vadd.f32 %v631_v63, %v583_v46  ;;  %v710_v2 = vpack.c.bf16 %v704_v61, %v701_v52  ;;  %v694_v6 = vmax.f32 %v628_v59, 0.0 }
 0x39d   :  { %v696_v4 = vmax.f32 %v630_v62, 0.0  ;;  %v707_v5 = vpack.c.bf16 %v698_v0, %v695_v57 }
 0x39e   :  { %v697_v7 = vmax.f32 %v632_v1, 0.0 }
 0x39f   :  { %v705_v8 = vpack.c.bf16 %v696_v4, %v693_v3  ;;  %1457 = vmatprep.mubr.bf16.mxu0 %v707_v5  ;;  %v1587_v4 = vld [vmem:[%s1927_s4 + $0x30] sm:$0xff]   ;;  %v1588_v5 = vld [vmem:[%s1927_s4 + $0x38] sm:$0xff]  }
 0x3a0   :  { %v706_v9 = vpack.c.bf16 %v697_v7, %v694_v6  ;;  %v635_v11 = vpop.f32.mrb[16].mxu1  ;;  %1458 = vmatmul.mubr.bf16.vlgmr.msra.gmra.mrb[12].mxu0 %v710_v2  ;;  %v1281_v6 = vld [vmem:[%s1928_s5 + $0x5] ss:$0 sm:$0xff] }
 0x3a1   :  { %v636_v12 = vadd.f32 %v635_v11, %v579_v44  ;;  %v637_v13 = vpop.f32.mrb[17].mxu1  ;;  %1482 = vmatpush3.bf16.msra.mxu0 %v1581_v31 }
 0x3a2   :  { %v638_v15 = vadd.f32 %v637_v13, %v583_v46  ;;  %v639_v16 = vpop.f32.mrb[18].mxu1  ;;  %893 = vmatprep.mubr.bf16.mxu1 %v706_v9  ;;  %1483 = vmatprep.subr.bf16.mxu0 %v1582_v32 }
 0x3a3   :  { %v640_v17 = vadd.f32 %v639_v16, %v579_v44  ;;  %v641_v18 = vpop.f32.mrb[19].mxu1  ;;  %894 = vmatmul.mubr.bf16.vlgmr.msra.gmra.mrb[20].mxu1 %v705_v8  ;;  %v699_v20 = vmax.f32 %v636_v12, 0.0 }
 0x3a4   :  { %v642_v19 = vadd.f32 %v641_v18, %v583_v46  ;;  %1462 = vmatpush3.bf16.msra.mxu1 %v1573_v36  ;;  %v700_v22 = vmax.f32 %v638_v15, 0.0  ;;  %v1586_v36 = vld [vmem:[%s1927_s4 + $0x28] sm:$0xff]  }
 0x3a5   :  { %v702_v21 = vmax.f32 %v640_v17, 0.0  ;;  %1463 = vmatprep.subr.bf16.mxu1 %v1574_v14  ;;  %1484 = vmatpush3.bf16.msra.mxu0 %v1582_v32 }
 0x3a6   :  { %v703_v23 = vmax.f32 %v642_v19, 0.0  ;;  %1485 = vmatprep.subr.bf16.mxu0 %v1583_v33 }
 0x3a7   :  { %v708_v25 = vpack.c.bf16 %v702_v21, %v699_v20 }
 0x3a8   :  { %v709_v26 = vpack.c.bf16 %v703_v23, %v700_v22  ;;  %1464 = vmatpush3.bf16.msra.mxu1 %v1574_v14 }
 0x3a9   :  { %1465 = vmatprep.subr.bf16.mxu1 %v1575_v10  ;;  %1486 = vmatpush3.bf16.msra.mxu0 %v1583_v33 }
 0x3aa   :  { %901 = vmatprep.mubr.bf16.mxu1 %v709_v26  ;;  %1487 = vmatprep.subr.bf16.mxu0 %v1584_v34 }
 0x3ab   :  { %902 = vmatmul.mubr.bf16.gmra.mrb[24].mxu1 %v708_v25 }
 0x3ac   :  { %1466 = vmatpush3.bf16.msra.mxu1 %v1575_v10  ;;  %v1290_v10 = vld [vmem:[%s1928_s5 + $0x6] ss:$0 sm:$0xff] }
 0x3ad   :  { %1467 = vmatprep.subr.bf16.mxu1 %v1576_v27  ;;  %1488 = vmatpush3.bf16.msra.mxu0 %v1584_v34 }
 0x3ae   :  { %1489 = vmatprep.subr.bf16.mxu0 %v1585_v35 }
 0x3b0   :  { %1468 = vmatpush3.bf16.msra.mxu1 %v1576_v27 }
 0x3b1   :  { %1469 = vmatprep.subr.bf16.mxu1 %v1577_v24  ;;  %1490 = vmatpush3.bf16.msra.mxu0 %v1585_v35 }
 0x3b2   :  { %1491 = vmatprep.subr.bf16.mxu0 %v1586_v36 }
 0x3b4   :  { %1470 = vmatpush3.bf16.msra.mxu1 %v1577_v24 }
 0x3b5   :  { %1471 = vmatprep.subr.bf16.mxu1 %v1578_v28  ;;  %1492 = vmatpush3.bf16.msra.mxu0 %v1586_v36 }
 0x3b6   :  { %1493 = vmatprep.subr.bf16.mxu0 %v1587_v4 }
 0x3b8   :  { %1472 = vmatpush3.bf16.msra.mxu1 %v1578_v28 }
 0x3b9   :  { %1473 = vmatprep.subr.bf16.mxu1 %v1579_v29  ;;  %1494 = vmatpush3.bf16.msra.mxu0 %v1587_v4 }
 0x3ba   :  { %1495 = vmatprep.subr.bf16.mxu0 %v1588_v5 }
 0x3bc   :  { %1474 = vmatpush3.bf16.msra.mxu1 %v1579_v29 }
 0x3bd   :  { %1475 = vmatprep.subr.bf16.mxu1 %v1580_v30  ;;  %1496 = vmatpush3.bf16.msra.mxu0 %v1588_v5 }
 0x3c0   :  { %1476 = vmatpush3.bf16.msra.mxu1 %v1580_v30 }
 0x473   :  { %v1459_v37 = vpop.f32.mrb[12].mxu0 }
 0x474   :  { %v944_v38 = vpop.f32.mrb[13].mxu0 }
 0x475   :  { %v1460_v39 = vpop.f32.mrb[14].mxu0 }
 0x476   :  { %v1343_v40 = vpop.f32.mrb[20].mxu1  ;;  %v947_v41 = vpop.f32.mrb[15].mxu0 }
 0x477   :  { %v1344_v42 = vpop.f32.mrb[21].mxu1 }
 0x478   :  { %v1345_v44 = vadd.f32 %v1344_v42, %v1343_v40  ;;  %v1346_v45 = vpop.f32.mrb[22].mxu1 }
 0x479   :  { %v1347_v46 = vpop.f32.mrb[23].mxu1 }
 0x47a   :  { %v1348_v47 = vadd.f32 %v1347_v46, %v1346_v45  ;;  %v896_v48 = vadd.f32 %v1345_v44, %v1256_v43 }
 0x47c   :  { %v945_v49 = vadd.f32 %v944_v38, %v896_v48  ;;  %v899_v50 = vadd.f32 %v1348_v47, %v1256_v43 }
 0x47e   :  { %v948_v51 = vadd.f32 %v947_v41, %v899_v50  ;;  %v1349_v52 = vpop.f32.mrb[24].mxu1  ;;  %v959_v54 = vmax.f32 %v945_v49, 0.0 }
 0x47f   :  { %v1350_v53 = vpop.f32.mrb[25].mxu1 }
 0x480   :  { %v960_v55 = vmax.f32 %v948_v51, 0.0  ;;  %v1351_v56 = vadd.f32 %v1350_v53, %v1349_v52  ;;  %v1352_v57 = vpop.f32.mrb[26].mxu1 }
 0x481   :  { %v1353_v58 = vpop.f32.mrb[27].mxu1 }
 0x482   :  { %v963_v59 = vpack.c.bf16 %v960_v55, %v959_v54  ;;  %v904_v60 = vadd.f32 %v1351_v56, %v1256_v43  ;;  %v1354_v61 = vadd.f32 %v1353_v58, %v1352_v57 }
 0x484   :  { %v953_v62 = vadd.f32 %v1459_v37, %v904_v60  ;;  %v907_v63 = vadd.f32 %v1354_v61, %v1256_v43  ;;  %1477 = vmatprep.mubr.bf16.mxu1 %v963_v59 }
 0x486   :  { %v956_v0 = vadd.f32 %v1460_v39, %v907_v63  ;;  %v961_v1 = vmax.f32 %v953_v62, 0.0 }
 0x488   :  { %v962_v2 = vmax.f32 %v956_v0, 0.0 }
 0x48a   :  { %v964_v3 = vpack.c.bf16 %v962_v2, %v961_v1 }
 0x48c   :  { %1478 = vmatmul.mubr.bf16.vlgmr.msra.gmra.mrb[28].mxu1 %v964_v3 }
 0x55f   :  { %v1479_v7 = vpop.f32.mrb[28].mxu1 }
 0x560   :  { %v1062_v8 = vadd.f32 %v1479_v7, %v1281_v6  ;;  %v1053_v9 = vpop.f32.mrb[29].mxu1 }
 0x561   :  { %v1054_v11 = vadd.f32 %v1281_v6, %v1053_v9  ;;  %v1480_v12 = vpop.f32.mrb[30].mxu1 }
 0x562   :  { %v1065_v13 = vadd.f32 %v1480_v12, %v1281_v6  ;;  %v1056_v14 = vpop.f32.mrb[31].mxu1  ;;  %v1070_v16 = vmax.f32 %v1062_v8, 0.0 }
 0x563   :  { %v1057_v15 = vadd.f32 %v1281_v6, %v1056_v14  ;;  %v1068_v18 = vmax.f32 %v1054_v11, 0.0 }
 0x564   :  { %v1071_v17 = vmax.f32 %v1065_v13, 0.0 }
 0x565   :  { %v1069_v19 = vmax.f32 %v1057_v15, 0.0 }
 0x566   :  { %v1073_v20 = vpack.c.bf16 %v1071_v17, %v1070_v16 }
 0x567   :  { %v1072_v21 = vpack.c.bf16 %v1069_v19, %v1068_v18 }
 0x569   :  { %1497 = vmatprep.mubr.bf16.mxu0 %v1072_v21 }
 0x56a   :  { %1498 = vmatmul.mubr.bf16.vlgmr.msra.gmra.mrb[16].mxu0 %v1073_v20 }
 0x63d   :  { %v1499_v22 = vpop.f32.mrb[16].mxu0 }
 0x63e   :  { %v1187_v23 = vadd.f32 %v1499_v22, %v1290_v10  ;;  %v1178_v25 = vpop.f32.mrb[17].mxu0 }
 0x63f   :  { %v1179_v26 = vadd.f32 %v1290_v10, %v1178_v25  ;;  %v1500_v27 = vpop.f32.mrb[18].mxu0 }
 0x640   :  { %1195 = vst [vmem:[#allocation2 + $0x10] sm:$0xff] %v1187_v23  ;;  %v1190_v24 = vadd.f32 %v1500_v27, %v1290_v10  ;;  %v1181_v28 = vpop.f32.mrb[19].mxu0 }
 0x641   :  { %1193 = vst [vmem:[#allocation2] sm:$0xff] %v1179_v26  ;;  %v1182_v29 = vadd.f32 %v1290_v10, %v1181_v28 }
 0x642   :  { %1196 = vst [vmem:[#allocation2 + $0x18] sm:$0xff] %v1190_v24 }
 0x643   :  { %1194 = vst [vmem:[#allocation2 + $0x8] sm:$0xff] %v1182_v29 }
 0x644   :  { %1600 = shalt.err (!%p1597_p4)
}
 0x645   :  { %s1601_s28 = scalar_lea.hbm %s1929_s6, 512 }
 0x646   :  { %p1602_p5 = scmp.ne.s32.totalorder %s1929_s6, %s1601_s28  ;;  %p1605_p6 = scmp.lt.u32.totalorder %s1601_s28, %s1929_s6 }
 0x648   :  { %p1607_p7 = pnand %p1605_p6, %p1602_p5 }
 0x64a   :  { %1610 = shalt.err (!%p1607_p7)
}
 0x64b   :  { %s1615_s9 = smov 128   ;;  %s1616_s10 = smov 8  }
 0x64c   :  { %1208 = dma.vmem_to_hbm [thread:$0]  %s1203_s25, 512, %s1929_s6, [#allocation3], %s1615_s9, %s1615_s9, %s1616_s10  }
 0x64d   :  { %1611 = dma.done.wait [#allocation3], 512  }
 0x64e   :  { %1612 = vsyncadd [#allocation3], 4294966784 }
 0x64f   :  { %1212 = vsyncpa [#allocation3], 1 }

</bundles_post_ra>
